<compile_context>
chip_gen: v5e
topology: v5e:2x2
jax: 0.10.0
libtpu: 0.0.40
codegen_flags: <defaults>
</compile_context>

<pallas_src>
import jax
import jax.numpy as jnp
from jax import lax
from jax.experimental import pallas as pl
from jax.experimental.pallas import tpu as pltpu

FEATURE_DIM = 14
OUTPUT_DIM = 2


def linear_kernel(x_ref, w_ref, b_ref, o_ref):
    # x_ref: (tb, FEATURE_DIM)          f32 VMEM  (activation tile, untransposed)
    # w_ref: (OUTPUT_DIM, FEATURE_DIM)  f32 VMEM  (tiny weight, no SMEM scalar reads)
    # b_ref: (OUTPUT_DIM, 1)            f32 VMEM  (bias column, broadcasts over lanes)
    # o_ref: (OUTPUT_DIM, tb)           f32 VMEM  (lane-dense output: lane dim = batch)
    #
    # Single MXU contraction (contract the last dims of both operands, i.e. a
    # trans_b matmul: (2,14) x (tb,14)^T -> (2,tb)).  This replaces the old
    # 28-term scalar-broadcast VALU chain; the kernel is now memory-bound.
    s = lax.dot_general(
        w_ref[...], x_ref[...],
        dimension_numbers=(((1,), (1,)), ((), ())),
        preferred_element_type=jnp.float32,
    )
    o_ref[...] = (s + b_ref[...]).astype(o_ref.dtype)


def _round_up(n, m):
    return ((n + m - 1) // m) * m


def linear_forward(x, weight, bias, *, tb=32768):
    """torch.nn.Linear forward: y = x @ weight.T + bias.

    x: (B, FEATURE_DIM) f32; weight: (OUTPUT_DIM, FEATURE_DIM); bias: (OUTPUT_DIM,).
    Returns (B, OUTPUT_DIM).
    """
    B = x.shape[0]
    b_col = bias.reshape(OUTPUT_DIM, 1)  # lane-broadcastable bias column

    if B <= tb:
        # Single-shot: whole problem is VMEM-resident in one call; no grid /
        # pipelining bookkeeping to amortize.
        out = pl.pallas_call(
            linear_kernel,
            out_shape=jax.ShapeDtypeStruct((OUTPUT_DIM, B), x.dtype),
            in_specs=[
                pl.BlockSpec(memory_space=pltpu.MemorySpace.VMEM),  # x
                pl.BlockSpec(memory_space=pltpu.MemorySpace.VMEM),  # weight
                pl.BlockSpec(memory_space=pltpu.MemorySpace.VMEM),  # bias col
            ],
            out_specs=pl.BlockSpec(memory_space=pltpu.MemorySpace.VMEM),
        )(x, weight, b_col)
        return out.T  # (B, OUTPUT_DIM)

    # Batch-tiled path.  Tile choice:
    #  - multiple of 128 so the lane-dense (2, tb) output block satisfies the
    #    (8, 128) constraint and stores stay unmasked;
    #  - capped so the x block (lane-padded to 128 in VMEM -> 512 B/row,
    #    double-buffered) stays ~34 MiB: fits v7x's 64 MiB physical VMEM with
    #    headroom (48 MiB budget below) and is far under v5e/v6e's 128 MiB;
    #  - at most ~B/2 so the grid has >= 2 steps and the "parallel" batch axis
    #    can actually split across v7x's two TensorCores.
    tb_eff = min(_round_up(tb, 128), _round_up(pl.cdiv(B, 2), 128))
    grid = (pl.cdiv(B, tb_eff),)
    out = pl.pallas_call(
        linear_kernel,
        out_shape=jax.ShapeDtypeStruct((OUTPUT_DIM, B), x.dtype),
        grid_spec=pl.GridSpec(
            grid=grid,
            in_specs=[
                # (tb, 14): 14 == full trailing dim, tb multiple of 8 -> legal.
                pl.BlockSpec((tb_eff, FEATURE_DIM), lambda i: (i, 0)),
                # Tiny params live in VMEM as full-array blocks (28 + 2 floats);
                # no SMEM scalar-load / broadcast chains.
                pl.BlockSpec((OUTPUT_DIM, FEATURE_DIM), lambda i: (0, 0)),
                pl.BlockSpec((OUTPUT_DIM, 1), lambda i: (0, 0)),
            ],
            # Lane-dense output: lane dim = batch -> unmasked stores and a
            # streaming writeback DMA (biggest single lever per perf review).
            out_specs=pl.BlockSpec((OUTPUT_DIM, tb_eff), lambda i: (0, i)),
        ),
        compiler_params=pltpu.CompilerParams(
            dimension_semantics=("parallel",),
            # ~34 MiB live at tb=32768; 48 MiB leaves headroom on v7x (64 MiB
            # physical) and is well within v5e/v6e's 128 MiB.
            vmem_limit_bytes=48 * 1024 * 1024,
        ),
    )(x, weight, b_col)
    return out.T


if __name__ == "__main__":
    key = jax.random.PRNGKey(0)
    kx, kw, kb, kx2 = jax.random.split(key, 4)

    # torch.nn.Linear-style uniform(-1/sqrt(fan_in), 1/sqrt(fan_in)) init.
    bound = 1.0 / (FEATURE_DIM ** 0.5)
    weight = jax.random.uniform(kw, (OUTPUT_DIM, FEATURE_DIM),
                                minval=-bound, maxval=bound, dtype=jnp.float32)
    bias = jax.random.uniform(kb, (OUTPUT_DIM,),
                              minval=-bound, maxval=bound, dtype=jnp.float32)

    # Small single-shot check (matches the module's intended tiny input).
    B = 8
    x = jax.random.normal(kx, (B, FEATURE_DIM), dtype=jnp.float32)
    y = linear_forward(x, weight, bias)
    jax.block_until_ready(y)
    y_ref = x @ weight.T + bias
    assert y.shape == (B, OUTPUT_DIM)
    assert jnp.allclose(y, y_ref, atol=1e-5, rtol=1e-5)

    # Exercise the batch-tiled grid path (small tile, including a partial
    # last block) so that path is compile- and correctness-verified too.
    B2 = 600
    x2 = jax.random.normal(kx2, (B2, FEATURE_DIM), dtype=jnp.float32)
    y2 = linear_forward(x2, weight, bias, tb=128)
    jax.block_until_ready(y2)
    y2_ref = x2 @ weight.T + bias
    assert y2.shape == (B2, OUTPUT_DIM)
    assert jnp.allclose(y2, y2_ref, atol=1e-5, rtol=1e-5)

    print("KERNEL_OK")
</pallas_src>

<mosaic_0001>
module attributes {stable_mosaic.version = 11 : i64} {
  func.func @linear_kernel(%arg0: memref<8x14xf32, #tpu.memory_space<vmem>>, %arg1: memref<2x14xf32, #tpu.memory_space<vmem>>, %arg2: memref<2x1xf32, #tpu.memory_space<vmem>>, %arg3: memref<2x8xf32, #tpu.memory_space<vmem>>) attributes {dimension_semantics = [], scalar_prefetch = 0 : i64, scratch_operands = 0 : i64, tpu.core_type = #tpu.core_type<tc>} {
    %c0 = arith.constant 0 : index
    %c0_0 = arith.constant 0 : index
    %0 = vector.load %arg1[%c0, %c0_0] : memref<2x14xf32, #tpu.memory_space<vmem>>, vector<2x14xf32>
    %c0_1 = arith.constant 0 : index
    %c0_2 = arith.constant 0 : index
    %1 = vector.load %arg0[%c0_1, %c0_2] : memref<8x14xf32, #tpu.memory_space<vmem>>, vector<8x14xf32>
    %cst = arith.constant dense<0.000000e+00> : vector<2x8xf32>
    %2 = tpu.matmul %0, %1, %cst {dimension_numbers = #tpu.dot_dimension_numbers<[1], [1], [0], [0], [0, 0, 1, 0], [], []>} : vector<2x14xf32>, vector<8x14xf32>, vector<2x8xf32> -> vector<2x8xf32>
    %c0_3 = arith.constant 0 : index
    %c0_4 = arith.constant 0 : index
    %3 = vector.load %arg2[%c0_3, %c0_4] : memref<2x1xf32, #tpu.memory_space<vmem>>, vector<2x1xf32>
    %4 = vector.broadcast %3 : vector<2x1xf32> to vector<2x8xf32>
    %5 = arith.addf %2, %4 : vector<2x8xf32>
    %c0_5 = arith.constant 0 : index
    %c0_6 = arith.constant 0 : index
    %6 = vector.load %arg3[%c0_5, %c0_6] : memref<2x8xf32, #tpu.memory_space<vmem>>, vector<2x8xf32>
    tpu.vector_store %arg3[%c0_5, %c0_6], %5 {strides = array<i32>} : memref<2x8xf32, #tpu.memory_space<vmem>>, vector<2x8xf32>,
    return
  }
}

</mosaic_0001>

<bundles_post_ra>
// kernel: tpu_custom_call.1
= control target key start
LH: loop header
LB: loop body
LE: loop exit
PB: predicated region body
PF: predicated region fallthrough
CT: control target
= control target key end

     0   :  { %8 = vsyncpa [#allocation3], 0  ;;  %s176_s0 = inlined_call_operand.hbm [shape: f32[8,14], index: 0, kind: input, shape index: {}]   ;;  %s177_s1 = inlined_call_operand.vmem [shape: f32[2,14], index: 1, kind: input, shape index: {}]   ;;  %s178_s2 = inlined_call_operand.vmem [shape: f32[2,1], index: 2, kind: input, shape index: {}]   ;;  %s179_s3 = inlined_call_operand.hbm [shape: f32[2,8], index: 3, kind: output, shape index: {}]  }
   0x1   :  { %9 = vsyncpa [#allocation4], 0  ;;  %s15_s14 = sshll.u32 %s176_s0, 4  ;;  %s141_s15 = smov [#allocation2]   ;;  %s16_s14 = int_to_ptr.hbm [resolvable:$true] %s15_s14 }
   0x2   :  { %s17_s16 = sshll.u32 %s141_s15, 4  ;;  %s18_s16 = int_to_ptr.vmem [resolvable:$true] %s17_s16 }
   0x3   :  { %20 = dma.hbm_to_vmem [thread:$0]  %s16_s14, 128, %s18_s16, [#allocation3]  }
   0x4   :  { %137 = dma.done.wait [#allocation3], 128  }
   0x5   :  { %138 = vsyncadd [#allocation3], 4294967168  ;;  %v142_v0 = vmov 0   ;;  %vm37_vm0 = vcmask 113664   ;;  %v30_v1 = vld [vmem:[#allocation2] sm:$0xff]  ;;  %s143_s0 = smov [#allocation5]  }
   0x6   :  { %88 = vset.pattern.permute.xlu0 %v142_v0  ;;  %v31_v2 = vld [vmem:[%s178_s2] sm:$0x3]  ;;  %83 = vmatpush.xpose.msk.msra.mxu0 %vm37_vm0, %v30_v1  ;;  %s71_s21 = sshll.u32 %s143_s0, 4  ;;  %s73_s24 = sshll.u32 %s179_s3, 4  ;;  %vm64_vm1 = vcmask 58368   ;;  %s72_s21 = int_to_ptr.vmem [resolvable:$true] %s71_s21  ;;  %s74_s24 = int_to_ptr.hbm [resolvable:$true] %s73_s24 }
   0x7   :  { %v29_v3 = vld [vmem:[%s177_s1] sm:$0x3]  ;;  %34 = vperm.xlu0 %88, %v31_v2  }
   0x9   :  { %84 = vmatmul.msk.f32.vlgmr.msra.gmra.mxu0 %vm37_vm0, %v29_v3 }
  0x79   :  { %v35_v4 = vpop.permute.xlu0 %34 }
  0x86   :  { %v61_v5 = vpop.f32.mrf.mxu0 }
  0x87   :  { %v62_v6 = vadd.f32 %v61_v5, %v35_v4 }
  0x89   :  { %65 = vst.msk [vmem:[#allocation5] sm:$0x3] %vm64_vm1, %v62_v6 }
  0x8a   :  { %76 = dma.vmem_to_hbm [thread:$0]  %s72_s21, 32, %s74_s24, [#allocation4]  }
  0x8b   :  { %139 = dma.done.wait [#allocation4], 32  }
  0x8c   :  { %140 = vsyncadd [#allocation4], 4294967264 }
  0x8d   :  { %81 = vsyncpa [#allocation3], 1 }
  0x8e   :  { %82 = vsyncpa [#allocation4], 1 }

</bundles_post_ra>
